<compile_context>
chip_gen: v7x
topology: tpu7x:2x2x1
jax: 0.10.0
libtpu: 0.0.40
codegen_flags: <defaults>
</compile_context>

<pallas_src>
import functools

import jax
import jax.numpy as jnp
from jax.experimental import pallas as pl
from jax.experimental.pallas import tpu as pltpu


def _vmem_limit_bytes():
    """~64 MiB on 128-MiB-VMEM chips (v5e/v6e), ~48 MiB on v7x (64 MiB VMEM)."""
    cap = None
    try:
        cap = getattr(pltpu.get_tpu_info(), "vmem_capacity_bytes", None)
    except Exception:
        cap = None
    if not cap:
        cap = 128 << 20
    return int(min(64 << 20, (3 * cap) // 4))


# ------------------------------ fused kernel ------------------------------- #

def tokenizer_fused_kernel(x_ref, a_s_ref, b_s_ref, a_p_ref, b_p_ref,
                           gamma_ref, beta_ref, o_ref, ns_ref, *,
                           window_size, step_size, num_tokens, p_real,
                           inv_sample_width, inv_patch_width, eps):
    """Fused Tokenizer forward for `block_b` batch rows.

    x_ref     : (Bb, V, S)     samples, native layout (S in the lane dim)
    a_s_ref   : (Ds, V)        sample-level LSH projection
    b_s_ref   : (1, Ds)        sample-level LSH offset
    a_p_ref   : (W*Ds, P_pad)  patch-level LSH projection, rows permuted to
                               w-major (w*Ds + d), columns zero-padded to 128k
    b_p_ref   : (1, P_pad)     patch-level LSH offset (zero-padded)
    gamma_ref : (1, P_pad)     LayerNorm weight (zero-padded)
    beta_ref  : (1, P_pad)     LayerNorm bias (zero-padded)
    o_ref     : (Bb, T, P_pad) output tokens (pad lanes written as 0)
    ns_ref    : (S, Ds)        VMEM scratch for sample-level hash codes
    """
    block_b = x_ref.shape[0]
    sample_dim = a_s_ref.shape[0]
    p_pad = o_ref.shape[2]
    need_mask = p_pad != p_real
    inv_p = 1.0 / float(p_real)

    if need_mask:
        col = jax.lax.broadcasted_iota(jnp.int32, (num_tokens, p_pad), 1)
        lane_mask = col < p_real

    for b in range(block_b):
        # ---- stage 1: sample-level LSH over all S samples (one MXU matmul,
        #      contraction over V), then one tiny (Ds, S) -> (S, Ds) transpose.
        z = jnp.dot(a_s_ref[...], x_ref[b],
                    preferred_element_type=jnp.float32)               # (Ds, S)
        ns_ref[...] = jnp.trunc(
            (jnp.transpose(z) + b_s_ref[...]) * inv_sample_width)     # (S, Ds)

        # ---- stage 2+3: W accumulated matmuls over strided window slices.
        #      acc[t, p] += ns[t*step + w, :] @ A_p_w[w*Ds:(w+1)*Ds, :]
        acc = jnp.zeros((num_tokens, p_pad), jnp.float32)
        for w in range(window_size):
            acc = acc + jnp.dot(
                ns_ref[pl.ds(w, num_tokens, step_size), :],           # (T, Ds)
                a_p_ref[pl.ds(w * sample_dim, sample_dim), :],        # (Ds, P_pad)
                preferred_element_type=jnp.float32)

        q = jnp.trunc((acc + b_p_ref[...]) * inv_patch_width)         # (T, P_pad)

        # ---- LayerNorm over the REAL patch_dim columns only.
        # Padded columns of q are exactly 0 (zero-padded A_p / b_p), so the
        # mean sum is already correct; the variance term must be masked.
        if need_mask:
            q = jnp.where(lane_mask, q, 0.0)
        mu = jnp.sum(q, axis=-1, keepdims=True) * inv_p
        diff = q - mu
        diff_m = jnp.where(lane_mask, diff, 0.0) if need_mask else diff
        var = jnp.sum(diff_m * diff_m, axis=-1, keepdims=True) * inv_p
        y = diff * jax.lax.rsqrt(var + eps)
        # gamma/beta pad lanes are 0 -> pad lanes of the output store are 0.
        o_ref[b] = y * gamma_ref[...] + beta_ref[...]


# -------------------------------- Tokenizer -------------------------------- #

class TokenizerPallas:
    def __init__(self, num_variables, num_classes, sample_dim, patch_dim,
                 window_size, step_size, sample_width=1.0, patch_width=1.0,
                 key=jax.random.PRNGKey(0)):
        self.num_variables = num_variables
        self.num_classes = num_classes
        self.sample_dim = sample_dim
        self.patch_dim = patch_dim
        self.window_size = window_size
        self.step_size = step_size
        self.sample_width = float(sample_width)
        self.patch_width = float(patch_width)

        k1, k2, k3, k4 = jax.random.split(key, 4)
        # sample-level LSH: in = num_variables, out = sample_dim
        self.A_s = jax.random.normal(k1, (sample_dim, num_variables), jnp.float32)
        self.b_s = jax.random.uniform(k2, (1, sample_dim), jnp.float32,
                                      0.0, self.sample_width)
        # patch-level LSH: in = window_size * sample_dim, out = patch_dim
        k_in = window_size * sample_dim
        self.A_p = jax.random.normal(k3, (patch_dim, k_in), jnp.float32)
        self.b_p = jax.random.uniform(k4, (1, patch_dim), jnp.float32,
                                      0.0, self.patch_width)
        # LayerNorm(patch_dim) params
        self.gamma = jnp.ones((1, patch_dim), jnp.float32)
        self.beta = jnp.zeros((1, patch_dim), jnp.float32)

        # ---- kernel-friendly copies (built once on the host) ----
        # A_p_w[w*Ds + d, p] = A_p[p, d*W + w]  (w-major contraction order so
        # window w uses the contiguous row block [w*Ds, (w+1)*Ds)).
        a_p_w = jnp.transpose(
            jnp.transpose(self.A_p.reshape(patch_dim, sample_dim, window_size),
                          (0, 2, 1)).reshape(patch_dim, k_in))          # (K, P)
        # Zero-pad the patch axis to a lane multiple (dense output stores).
        self._p_pad = -(-patch_dim // 128) * 128
        pad = self._p_pad - patch_dim
        self._A_p_w = jnp.pad(a_p_w, ((0, 0), (0, pad)))                # (K, P_pad)
        self._b_p_pad = jnp.pad(self.b_p, ((0, 0), (0, pad)))
        self._gamma_pad = jnp.pad(self.gamma, ((0, 0), (0, pad)))
        self._beta_pad = jnp.pad(self.beta, ((0, 0), (0, pad)))

    # number of tokens == len(range(0, samples - window_size, step_size));
    # matches the torch code (the final full window is intentionally dropped
    # when (S - W) % step == 0 -- inherited off-by-one, keep it).
    def num_tokens(self, samples):
        n = samples - self.window_size
        if n <= 0:
            return 0
        return -(-n // self.step_size)

    @staticmethod
    def _pick_block_b(batch, cap=8):
        """Largest divisor of batch <= cap that still leaves >= 2 grid steps
        (so ("parallel",) can split across v7x's two TensorCores)."""
        if batch <= 1:
            return max(batch, 1)
        best = 1
        for bb in range(1, min(batch, cap) + 1):
            if batch % bb == 0 and batch // bb >= 2:
                best = bb
        return best

    def __call__(self, x):
        # x: (B, V, S)  -- native PyTorch layout, passed straight to the kernel
        B, V, S = x.shape
        if S < self.window_size:
            raise Exception("There are less samples than the window_size")
        T = self.num_tokens(S)
        if T == 0:
            return jnp.zeros((B, 0, self.patch_dim), jnp.float32)

        Ds, P, Pp = self.sample_dim, self.patch_dim, self._p_pad
        K = self.window_size * Ds
        Bb = self._pick_block_b(B)

        xf = x.astype(jnp.float32)

        kernel = functools.partial(
            tokenizer_fused_kernel,
            window_size=self.window_size, step_size=self.step_size,
            num_tokens=T, p_real=P,
            inv_sample_width=1.0 / self.sample_width,
            inv_patch_width=1.0 / self.patch_width,
            eps=1e-5)

        out = pl.pallas_call(
            kernel,
            out_shape=jax.ShapeDtypeStruct((B, T, Pp), jnp.float32),
            grid_spec=pltpu.PrefetchScalarGridSpec(
                num_scalar_prefetch=0,
                grid=(B // Bb,),
                in_specs=[
                    pl.BlockSpec((Bb, V, S), lambda i: (i, 0, 0)),  # x, native layout
                    pl.BlockSpec((Ds, V), lambda i: (0, 0)),        # A_s    (resident)
                    pl.BlockSpec((1, Ds), lambda i: (0, 0)),        # b_s    (resident)
                    pl.BlockSpec((K, Pp), lambda i: (0, 0)),        # A_p_w  (resident)
                    pl.BlockSpec((1, Pp), lambda i: (0, 0)),        # b_p    (resident)
                    pl.BlockSpec((1, Pp), lambda i: (0, 0)),        # gamma  (resident)
                    pl.BlockSpec((1, Pp), lambda i: (0, 0)),        # beta   (resident)
                ],
                out_specs=pl.BlockSpec((Bb, T, Pp), lambda i: (i, 0, 0)),
                scratch_shapes=[pltpu.VMEM((S, Ds), jnp.float32)],
            ),
            compiler_params=pltpu.CompilerParams(
                dimension_semantics=("parallel",),      # megacore on v7x
                vmem_limit_bytes=_vmem_limit_bytes(),
            ),
        )(xf, self.A_s, self.b_s, self._A_p_w, self._b_p_pad,
          self._gamma_pad, self._beta_pad)

        if Pp != P:
            out = out[:, :, :P]
        return out

    # pure-JAX reference (original weight orientation) for verification
    def reference(self, x):
        B, V, S = x.shape
        xf = x.astype(jnp.float32)
        hi = jax.lax.Precision.HIGHEST
        ns = jnp.trunc((jnp.einsum('bvs,dv->bds', xf, self.A_s, precision=hi)
                        + self.b_s.reshape(1, -1, 1)) / self.sample_width)
        starts = list(range(0, S - self.window_size, self.step_size))
        K = self.window_size * self.sample_dim
        patches = jnp.stack(
            [ns[:, :, w:w + self.window_size].reshape(B, K) for w in starts],
            axis=1)
        q = jnp.trunc((jnp.einsum('btk,pk->btp', patches, self.A_p, precision=hi)
                       + self.b_p.reshape(1, 1, -1)) / self.patch_width)
        mu = jnp.mean(q, axis=-1, keepdims=True)
        var = jnp.mean((q - mu) ** 2, axis=-1, keepdims=True)
        y = (q - mu) / jnp.sqrt(var + 1e-5)
        return y * self.gamma.reshape(1, 1, -1) + self.beta.reshape(1, 1, -1)


if __name__ == "__main__":
    # small shapes consistent with the module
    B, V, S = 2, 4, 16                 # batch, num_variables, samples
    sample_dim, patch_dim = 8, 16
    window_size, step_size = 4, 2

    key = jax.random.PRNGKey(0)
    k_weights, k_x = jax.random.split(key)

    tok = TokenizerPallas(num_variables=V, num_classes=3,
                          sample_dim=sample_dim, patch_dim=patch_dim,
                          window_size=window_size, step_size=step_size,
                          sample_width=1.0, patch_width=1.0,
                          key=k_weights)

    x = jax.random.normal(k_x, (B, V, S), jnp.float32)

    out = jax.block_until_ready(tok(x))

    ref = tok.reference(x)
    assert out.shape == ref.shape, (out.shape, ref.shape)
    # f32 accumulation-order differences can in principle flip a trunc() at an
    # integer boundary; with these continuous random inputs the values stay
    # well clear of boundaries, so a tight tolerance is appropriate.
    assert jnp.allclose(out, ref, atol=2e-3, rtol=2e-3), \
        float(jnp.max(jnp.abs(out - ref)))

    print("KERNEL_OK")
</pallas_src>

<mosaic_0001>
module attributes {stable_mosaic.version = 11 : i64} {
  func.func @tokenizer_fused_kernel(%arg0: i32, %arg1: memref<1x4x16xf32, #tpu.memory_space<vmem>>, %arg2: memref<8x4xf32, #tpu.memory_space<vmem>>, %arg3: memref<1x8xf32, #tpu.memory_space<vmem>>, %arg4: memref<32x128xf32, #tpu.memory_space<vmem>>, %arg5: memref<1x128xf32, #tpu.memory_space<vmem>>, %arg6: memref<1x128xf32, #tpu.memory_space<vmem>>, %arg7: memref<1x128xf32, #tpu.memory_space<vmem>>, %arg8: memref<1x6x128xf32, #tpu.memory_space<vmem>>, %arg9: memref<16x8xf32, #tpu.memory_space<vmem>>) attributes {dimension_semantics = [#tpu.dimension_semantics<parallel>], iteration_bounds = array<i64: 2>, scalar_prefetch = 0 : i64, scratch_operands = 1 : i64, tpu.core_type = #tpu.core_type<tc>, window_params = [{transform_indices = @transform_0, window_bounds = array<i64: 1, 4, 16>}, {pipeline_mode = #tpu.pipeline_mode<synchronous>, transform_indices = @transform_1, window_bounds = array<i64: 8, 4>}, {pipeline_mode = #tpu.pipeline_mode<synchronous>, transform_indices = @transform_2, window_bounds = array<i64: 1, 8>}, {pipeline_mode = #tpu.pipeline_mode<synchronous>, transform_indices = @transform_3, window_bounds = array<i64: 32, 128>}, {pipeline_mode = #tpu.pipeline_mode<synchronous>, transform_indices = @transform_4, window_bounds = array<i64: 1, 128>}, {pipeline_mode = #tpu.pipeline_mode<synchronous>, transform_indices = @transform_5, window_bounds = array<i64: 1, 128>}, {pipeline_mode = #tpu.pipeline_mode<synchronous>, transform_indices = @transform_6, window_bounds = array<i64: 1, 128>}, {transform_indices = @transform_7, window_bounds = array<i64: 1, 6, 128>}]} {
    %0 = tpu.iota {dimensions = array<i32: 1>} : vector<6x128xi32>
    %c16_i32 = arith.constant 16 : i32
    %1 = vector.broadcast %c16_i32 : i32 to vector<6x128xi32>
    %2 = arith.cmpi slt, %0, %1 : vector<6x128xi32>
    %c0 = arith.constant 0 : index
    %c0_0 = arith.constant 0 : index
    %3 = vector.load %arg2[%c0, %c0_0] : memref<8x4xf32, #tpu.memory_space<vmem>>, vector<8x4xf32>
    %c0_1 = arith.constant 0 : index
    %c0_2 = arith.constant 0 : index
    %c0_3 = arith.constant 0 : index
    %4 = vector.load %arg1[%c0_1, %c0_2, %c0_3] : memref<1x4x16xf32, #tpu.memory_space<vmem>>, vector<1x4x16xf32>
    %5 = vector.shape_cast %4 : vector<1x4x16xf32> to vector<4x16xf32>
    %cst = arith.constant dense<0.000000e+00> : vector<8x16xf32>
    %6 = tpu.matmul %3, %5, %cst {dimension_numbers = #tpu.dot_dimension_numbers<[1], [0], [0], [1], [0, 0, 1, 1], [], []>} : vector<8x4xf32>, vector<4x16xf32>, vector<8x16xf32> -> vector<8x16xf32>
    %7 = tpu.transpose %6, [1, 0] : vector<8x16xf32> -> vector<16x8xf32>
    %c0_4 = arith.constant 0 : index
    %c0_5 = arith.constant 0 : index
    %8 = vector.load %arg3[%c0_4, %c0_5] : memref<1x8xf32, #tpu.memory_space<vmem>>, vector<1x8xf32>
    %9 = vector.broadcast %8 : vector<1x8xf32> to vector<16x8xf32>
    %10 = arith.addf %7, %9 : vector<16x8xf32>
    %cst_6 = arith.constant 1.000000e+00 : f32
    %11 = vector.broadcast %cst_6 : f32 to vector<16x8xf32>
    %12 = arith.mulf %10, %11 : vector<16x8xf32>
    %cst_7 = arith.constant 0.000000e+00 : f32
    %13 = vector.broadcast %cst_7 : f32 to vector<16x8xf32>
    %14 = arith.cmpf olt, %12, %13 : vector<16x8xf32>
    %15 = math.ceil %12 : vector<16x8xf32>
    %16 = math.floor %12 : vector<16x8xf32>
    %17 = arith.select %14, %15, %16 : vector<16x8xi1>, vector<16x8xf32>
    %c0_8 = arith.constant 0 : index
    %c0_9 = arith.constant 0 : index
    %18 = vector.load %arg9[%c0_8, %c0_9] : memref<16x8xf32, #tpu.memory_space<vmem>>, vector<16x8xf32>
    tpu.vector_store %arg9[%c0_8, %c0_9], %17 {strides = array<i32>} : memref<16x8xf32, #tpu.memory_space<vmem>>, vector<16x8xf32>,
    %cst_10 = arith.constant 0.000000e+00 : f32
    %19 = vector.broadcast %cst_10 : f32 to vector<6x128xf32>
    %c0_11 = arith.constant 0 : index
    %c0_12 = arith.constant 0 : index
    %20 = tpu.strided_load %arg9[%c0_11, %c0_12] {strides = array<i32: 2, 1>} : memref<16x8xf32, #tpu.memory_space<vmem>>, vector<6x8xf32>
    %c0_13 = arith.constant 0 : index
    %c0_14 = arith.constant 0 : index
    %21 = vector.load %arg4[%c0_13, %c0_14] : memref<32x128xf32, #tpu.memory_space<vmem>>, vector<8x128xf32>
    %cst_15 = arith.constant dense<0.000000e+00> : vector<6x128xf32>
    %22 = tpu.matmul %20, %21, %cst_15 {dimension_numbers = #tpu.dot_dimension_numbers<[1], [0], [0], [1], [0, 0, 1, 1], [], []>} : vector<6x8xf32>, vector<8x128xf32>, vector<6x128xf32> -> vector<6x128xf32>
    %23 = arith.addf %19, %22 : vector<6x128xf32>
    %c1 = arith.constant 1 : index
    %c0_16 = arith.constant 0 : index
    %24 = tpu.strided_load %arg9[%c1, %c0_16] {strides = array<i32: 2, 1>} : memref<16x8xf32, #tpu.memory_space<vmem>>, vector<6x8xf32>
    %c8 = arith.constant 8 : index
    %c0_17 = arith.constant 0 : index
    %25 = vector.load %arg4[%c8, %c0_17] : memref<32x128xf32, #tpu.memory_space<vmem>>, vector<8x128xf32>
    %cst_18 = arith.constant dense<0.000000e+00> : vector<6x128xf32>
    %26 = tpu.matmul %24, %25, %cst_18 {dimension_numbers = #tpu.dot_dimension_numbers<[1], [0], [0], [1], [0, 0, 1, 1], [], []>} : vector<6x8xf32>, vector<8x128xf32>, vector<6x128xf32> -> vector<6x128xf32>
    %27 = arith.addf %23, %26 : vector<6x128xf32>
    %c2 = arith.constant 2 : index
    %c0_19 = arith.constant 0 : index
    %28 = tpu.strided_load %arg9[%c2, %c0_19] {strides = array<i32: 2, 1>} : memref<16x8xf32, #tpu.memory_space<vmem>>, vector<6x8xf32>
    %c16 = arith.constant 16 : index
    %c0_20 = arith.constant 0 : index
    %29 = vector.load %arg4[%c16, %c0_20] : memref<32x128xf32, #tpu.memory_space<vmem>>, vector<8x128xf32>
    %cst_21 = arith.constant dense<0.000000e+00> : vector<6x128xf32>
    %30 = tpu.matmul %28, %29, %cst_21 {dimension_numbers = #tpu.dot_dimension_numbers<[1], [0], [0], [1], [0, 0, 1, 1], [], []>} : vector<6x8xf32>, vector<8x128xf32>, vector<6x128xf32> -> vector<6x128xf32>
    %31 = arith.addf %27, %30 : vector<6x128xf32>
    %c3 = arith.constant 3 : index
    %c0_22 = arith.constant 0 : index
    %32 = tpu.strided_load %arg9[%c3, %c0_22] {strides = array<i32: 2, 1>} : memref<16x8xf32, #tpu.memory_space<vmem>>, vector<6x8xf32>
    %c24 = arith.constant 24 : index
    %c0_23 = arith.constant 0 : index
    %33 = vector.load %arg4[%c24, %c0_23] : memref<32x128xf32, #tpu.memory_space<vmem>>, vector<8x128xf32>
    %cst_24 = arith.constant dense<0.000000e+00> : vector<6x128xf32>
    %34 = tpu.matmul %32, %33, %cst_24 {dimension_numbers = #tpu.dot_dimension_numbers<[1], [0], [0], [1], [0, 0, 1, 1], [], []>} : vector<6x8xf32>, vector<8x128xf32>, vector<6x128xf32> -> vector<6x128xf32>
    %35 = arith.addf %31, %34 : vector<6x128xf32>
    %c0_25 = arith.constant 0 : index
    %c0_26 = arith.constant 0 : index
    %36 = vector.load %arg5[%c0_25, %c0_26] : memref<1x128xf32, #tpu.memory_space<vmem>>, vector<1x128xf32>
    %37 = vector.broadcast %36 : vector<1x128xf32> to vector<6x128xf32>
    %38 = arith.addf %35, %37 : vector<6x128xf32>
    %cst_27 = arith.constant 1.000000e+00 : f32
    %39 = vector.broadcast %cst_27 : f32 to vector<6x128xf32>
    %40 = arith.mulf %38, %39 : vector<6x128xf32>
    %cst_28 = arith.constant 0.000000e+00 : f32
    %41 = vector.broadcast %cst_28 : f32 to vector<6x128xf32>
    %42 = arith.cmpf olt, %40, %41 : vector<6x128xf32>
    %43 = math.ceil %40 : vector<6x128xf32>
    %44 = math.floor %40 : vector<6x128xf32>
    %45 = arith.select %42, %43, %44 : vector<6x128xi1>, vector<6x128xf32>
    %cst_29 = arith.constant 0.000000e+00 : f32
    %46 = vector.broadcast %cst_29 : f32 to vector<6x128xf32>
    %47 = arith.select %2, %45, %46 : vector<6x128xi1>, vector<6x128xf32>
    %cst_30 = arith.constant dense<0.000000e+00> : vector<6xf32>
    %48 = vector.multi_reduction <add>, %47, %cst_30 [1] : vector<6x128xf32> to vector<6xf32>
    %49 = vector.shape_cast %48 : vector<6xf32> to vector<6x1xf32>
    %cst_31 = arith.constant 6.250000e-02 : f32
    %50 = vector.broadcast %cst_31 : f32 to vector<6x1xf32>
    %51 = arith.mulf %49, %50 : vector<6x1xf32>
    %52 = vector.broadcast %51 : vector<6x1xf32> to vector<6x128xf32>
    %53 = arith.subf %47, %52 : vector<6x128xf32>
    %cst_32 = arith.constant 0.000000e+00 : f32
    %54 = vector.broadcast %cst_32 : f32 to vector<6x128xf32>
    %55 = arith.select %2, %53, %54 : vector<6x128xi1>, vector<6x128xf32>
    %56 = arith.mulf %55, %55 : vector<6x128xf32>
    %cst_33 = arith.constant dense<0.000000e+00> : vector<6xf32>
    %57 = vector.multi_reduction <add>, %56, %cst_33 [1] : vector<6x128xf32> to vector<6xf32>
    %58 = vector.shape_cast %57 : vector<6xf32> to vector<6x1xf32>
    %cst_34 = arith.constant 6.250000e-02 : f32
    %59 = vector.broadcast %cst_34 : f32 to vector<6x1xf32>
    %60 = arith.mulf %58, %59 : vector<6x1xf32>
    %cst_35 = arith.constant 9.99999974E-6 : f32
    %61 = vector.broadcast %cst_35 : f32 to vector<6x1xf32>
    %62 = arith.addf %60, %61 : vector<6x1xf32>
    %63 = math.rsqrt %62 : vector<6x1xf32>
    %64 = vector.broadcast %63 : vector<6x1xf32> to vector<6x128xf32>
    %65 = arith.mulf %53, %64 : vector<6x128xf32>
    %c0_36 = arith.constant 0 : index
    %c0_37 = arith.constant 0 : index
    %66 = vector.load %arg6[%c0_36, %c0_37] : memref<1x128xf32, #tpu.memory_space<vmem>>, vector<1x128xf32>
    %67 = vector.broadcast %66 : vector<1x128xf32> to vector<6x128xf32>
    %68 = arith.mulf %65, %67 : vector<6x128xf32>
    %c0_38 = arith.constant 0 : index
    %c0_39 = arith.constant 0 : index
    %69 = vector.load %arg7[%c0_38, %c0_39] : memref<1x128xf32, #tpu.memory_space<vmem>>, vector<1x128xf32>
    %70 = vector.broadcast %69 : vector<1x128xf32> to vector<6x128xf32>
    %71 = arith.addf %68, %70 : vector<6x128xf32>
    %c0_40 = arith.constant 0 : index
    %c0_41 = arith.constant 0 : index
    %c0_42 = arith.constant 0 : index
    %72 = vector.load %arg8[%c0_40, %c0_41, %c0_42] : memref<1x6x128xf32, #tpu.memory_space<vmem>>, vector<1x6x128xf32>
    %73 = vector.shape_cast %72 : vector<1x6x128xf32> to vector<6x128xf32>
    %74 = vector.shape_cast %71 : vector<6x128xf32> to vector<1x6x128xf32>
    tpu.vector_store %arg8[%c0_40, %c0_41, %c0_42], %74 {strides = array<i32>} : memref<1x6x128xf32, #tpu.memory_space<vmem>>, vector<1x6x128xf32>,
    return
  }
  func.func @transform_0(%arg0: i32) -> (i32, i32, i32) {
    %c0_i32 = arith.constant 0 : i32
    %c0_i32_0 = arith.constant 0 : i32
    %c0_i32_1 = arith.constant 0 : i32
    return %arg0, %c0_i32, %c0_i32_0 : i32, i32, i32
  }
  func.func @transform_1(%arg0: i32) -> (i32, i32) {
    %c0_i32 = arith.constant 0 : i32
    %c0_i32_0 = arith.constant 0 : i32
    %c0_i32_1 = arith.constant 0 : i32
    return %c0_i32, %c0_i32_0 : i32, i32
  }
  func.func @transform_2(%arg0: i32) -> (i32, i32) {
    %c0_i32 = arith.constant 0 : i32
    %c0_i32_0 = arith.constant 0 : i32
    %c0_i32_1 = arith.constant 0 : i32
    return %c0_i32, %c0_i32_0 : i32, i32
  }
  func.func @transform_3(%arg0: i32) -> (i32, i32) {
    %c0_i32 = arith.constant 0 : i32
    %c0_i32_0 = arith.constant 0 : i32
    %c0_i32_1 = arith.constant 0 : i32
    return %c0_i32, %c0_i32_0 : i32, i32
  }
  func.func @transform_4(%arg0: i32) -> (i32, i32) {
    %c0_i32 = arith.constant 0 : i32
    %c0_i32_0 = arith.constant 0 : i32
    %c0_i32_1 = arith.constant 0 : i32
    return %c0_i32, %c0_i32_0 : i32, i32
  }
  func.func @transform_5(%arg0: i32) -> (i32, i32) {
    %c0_i32 = arith.constant 0 : i32
    %c0_i32_0 = arith.constant 0 : i32
    %c0_i32_1 = arith.constant 0 : i32
    return %c0_i32, %c0_i32_0 : i32, i32
  }
  func.func @transform_6(%arg0: i32) -> (i32, i32) {
    %c0_i32 = arith.constant 0 : i32
    %c0_i32_0 = arith.constant 0 : i32
    %c0_i32_1 = arith.constant 0 : i32
    return %c0_i32, %c0_i32_0 : i32, i32
  }
  func.func @transform_7(%arg0: i32) -> (i32, i32, i32) {
    %c0_i32 = arith.constant 0 : i32
    %c0_i32_0 = arith.constant 0 : i32
    %c0_i32_1 = arith.constant 0 : i32
    return %arg0, %c0_i32, %c0_i32_0 : i32, i32, i32
  }
}

</mosaic_0001>

<bundles_post_ra>
// kernel: tpu_custom_call.1
= control target key start
LH: loop header
LB: loop body
LE: loop exit
PB: predicated region body
PF: predicated region fallthrough
CT: control target
= control target key end

     0   :  { %12 = vsyncpa [#allocation4], 0  ;;  %s1835_s0 = inlined_call_operand.hbm [shape: f32[2,4,16], index: 0, kind: input, shape index: {}]   ;;  %s1836_s1 = inlined_call_operand.hbm [shape: f32[8,4], index: 1, kind: input, shape index: {}]   ;;  %s1837_s2 = inlined_call_operand.hbm [shape: f32[1,8], index: 2, kind: input, shape index: {}]   ;;  %s1838_s3 = inlined_call_operand.hbm [shape: f32[32,128], index: 3, kind: input, shape index: {}]   ;;  %s1839_s4 = inlined_call_operand.hbm [shape: f32[1,128], index: 4, kind: input, shape index: {}]   ;;  %s1840_s5 = inlined_call_operand.hbm [shape: f32[1,128], index: 5, kind: input, shape index: {}]   ;;  %s1841_s6 = inlined_call_operand.hbm [shape: f32[1,128], index: 6, kind: input, shape index: {}]   ;;  %s1842_s7 = inlined_call_operand.hbm [shape: f32[2,6,128], index: 7, kind: output, shape index: {}]  }
   0x1   :  { %14 = vsyncpa [#allocation4 + $0x1], 0 }
   0x2   :  { %15 = vsyncpa [#allocation7], 0 }
   0x3   :  { %16 = vsyncpa [#allocation10], 0 }
   0x4   :  { %17 = vsyncpa [#allocation13], 0 }
   0x5   :  { %18 = vsyncpa [#allocation5], 0 }
   0x6   :  { %20 = vsyncpa [#allocation5 + $0x1], 0  ;;  %s1509_s24 = smov 0   ;;  %s1511_s25 = smov 0  }
   0x7   :  { %s1513_s26 = smov 0   ;;  %s1515_s27 = smov 0  }
   0x8 LB: > { %s1457_s28 = smov [#allocation6]   ;;  %s1530_s30 = sadd.s32 4294967295, %s1455_s27   ;;  %s1455_s27 = sphi %s1515_s27, %s1868_s27   ;;  %s1451_s26 = sphi %s1513_s26, %s1867_s26   ;;  %s1447_s25 = sphi %s1511_s25, %s1866_s25   ;;  %s1443_s24 = sphi %s1509_s24, %s1865_s24  }
   0x9   : > { %s222_s29 = sshll.u32 %s1457_s28, 4  ;;  %p998_p0 = scmp.ge.s32.totalorder %s1455_s27, 1  ;;  %s223_s29 = int_to_ptr.vmem [resolvable:$true] %s222_s29 }
   0xa   : > { %p1843_p1 = scmp.eq.s32.totalorder %s1530_s30, 0  ;;  %p209_p2 = scmp.lt.s32.totalorder %s1455_s27, 3 }
   0xb   : > { %s1458_s9 = smov [#allocation9]   ;;  %s1459_s12 = smov [#allocation12]  }
   0xc   : > { %p1535_p3 = pnand %p998_p0, %p209_p2  ;;  %s243_s10 = sshll.u32 %s1458_s9, 4  ;;  %s1542_s10 = int_to_ptr.vmem [resolvable:$true] %s243_s10 }
   0xd   : > { %s268_s13 = sshll.u32 %s1459_s12, 4  ;;  %s1179_s16 = scalar_lea.hbm %s1836_s1, 128  ;;  %s1550_s13 = int_to_ptr.vmem [resolvable:$true] %s268_s13 }
   0xe   : > { %s1846_s8 = scalar_select %p1535_p3, 1, 0 }
   0xf   : > { %p1094_p5 = pneg %p1535_p3  ;;  %p1180_p7 = scmp.ne.s32.totalorder %s1836_s1, %s1179_s16 }
  0x10   : > { %p1186_p11 = scmp.lt.u32.totalorder %s1179_s16, %s1836_s1 }
  0x11   : > { %p1546_p6 = pnand %p1094_p5, %p1843_p1 }
  0x13   : > { %p1560_p8 = pneg %p1546_p6 }
  0x15   : > { %p1182_p9 = pnand %p1560_p8, %p1180_p7 }
  0x17   : > { %p1183_p10 = pneg %p1182_p9 }
  0x19   : > { %p1188_p12 = pnand %p1186_p11, %p1183_p10 }
  0x1b   : > { %1191 = shalt.err (!%p1188_p12)
}
  0x1c   : > { %s1192_s22 = scalar_lea.vmem %s223_s29, 128  ;;  %p1200_p5 = scmp.lt.s32.totalorder %s223_s29, %s223_s29 }
  0x1d   : > { %p1193_p13 = scmp.ne.s32.totalorder %s223_s29, %s1192_s22  ;;  %p1201_p4 = scmp.lt.s32.totalorder %s1192_s22, %s1192_s22 }
  0x1f   : > { %p1195_p0 = pnand %p1193_p13, %p1560_p8  ;;  %p1202_p1 = por %p1201_p4, %p1200_p5 }
  0x21   : > { %p1196_p2 = pneg %p1195_p0 }
  0x23   : > { %p1203_p3 = pnand %p1202_p1, %p1196_p2 }
  0x25   : > { %1206 = shalt.err (!%p1203_p3)
}
  0x26   : > { %1097 = dma.hbm_to_vmem [thread:$0]  (!%p1546_p6), %s1836_s1, 128, %s223_s29, [#allocation7]  }
  0x27   : > { %s1207_s14 = scalar_lea.hbm %s1838_s3, 512 }
  0x28   : > { %p1208_p7 = scmp.ne.s32.totalorder %s1838_s3, %s1207_s14  ;;  %p1214_p1 = scmp.lt.u32.totalorder %s1207_s14, %s1838_s3 }
  0x2a   : > { %p1210_p9 = pnand %p1208_p7, %p1560_p8 }
  0x2c   : > { %p1211_p4 = pneg %p1210_p9 }
  0x2e   : > { %p1216_p3 = pnand %p1214_p1, %p1211_p4 }
  0x30   : > { %1219 = shalt.err (!%p1216_p3)
}
  0x31   : > { %s1220_s29 = scalar_lea.vmem %s1542_s10, 512  ;;  %p1228_p13 = scmp.lt.s32.totalorder %s1542_s10, %s1542_s10 }
  0x32   : > { %p1221_p10 = scmp.ne.s32.totalorder %s1542_s10, %s1220_s29  ;;  %p1229_p0 = scmp.lt.s32.totalorder %s1220_s29, %s1220_s29 }
  0x34   : > { %p1223_p11 = pnand %p1221_p10, %p1560_p8  ;;  %p1230_p2 = por %p1229_p0, %p1228_p13 }
  0x36   : > { %p1224_p12 = pneg %p1223_p11 }
  0x38   : > { %p1231_p5 = pnand %p1230_p2, %p1224_p12 }
  0x3a   : > { %1234 = shalt.err (!%p1231_p5)
}
  0x3b   : > { %s1460_s20 = smov 128   ;;  %s1461_s21 = smov 8  }
  0x3c   : > { %1103 = dma.hbm_to_vmem [thread:$0]  (!%p1546_p6), %s1838_s3, 512, %s1542_s10, [#allocation10], %s1460_s20, %s1460_s20, %s1461_s21  }
  0x3d   : > { %s1235_s12 = scalar_lea.hbm %s1840_s5, 16 }
  0x3e   : > { %p1236_p7 = scmp.ne.s32.totalorder %s1840_s5, %s1235_s12  ;;  %p1242_p1 = scmp.lt.u32.totalorder %s1235_s12, %s1840_s5 }
  0x40   : > { %p1238_p9 = pnand %p1236_p7, %p1560_p8 }
  0x42   : > { %p1239_p4 = pneg %p1238_p9 }
  0x44   : > { %p1244_p3 = pnand %p1242_p1, %p1239_p4 }
  0x46   : > { %1247 = shalt.err (!%p1244_p3)
}
  0x47   : > { %s1248_s10 = scalar_lea.vmem %s1550_s13, 16  ;;  %s1255_s18 = scalar_lea.vmem %s1550_s13, 32 }
  0x48   : > { %p1249_p10 = scmp.ne.s32.totalorder %s1550_s13, %s1248_s10  ;;  %p1256_p13 = scmp.lt.s32.totalorder %s1550_s13, %s1550_s13 }
  0x49   : > { %p1257_p0 = scmp.lt.s32.totalorder %s1255_s18, %s1248_s10 }
  0x4a   : > { %p1251_p11 = pnand %p1249_p10, %p1560_p8 }
  0x4b   : > { %p1258_p2 = por %p1257_p0, %p1256_p13 }
  0x4c   : > { %p1252_p12 = pneg %p1251_p11 }
  0x4e   : > { %p1259_p5 = pnand %p1258_p2, %p1252_p12 }
  0x50   : > { %1262 = shalt.err (!%p1259_p5)
}
  0x51   : > { %1109 = dma.hbm_to_vmem [thread:$0]  (!%p1546_p6), %s1840_s5, 16, %s1550_s13, [#allocation13]  }
  0x52   : > { %s1462_s21 = smov [#allocation8]   ;;  %s1463_s23 = smov [#allocation11]  }
  0x53   : > { %s233_s22 = sshll.u32 %s1462_s21, 4  ;;  %s257_s28 = sshll.u32 %s1463_s23, 4  ;;  %s234_s22 = int_to_ptr.vmem [resolvable:$true] %s233_s22  ;;  %s258_s28 = int_to_ptr.vmem [resolvable:$true] %s257_s28 }
  0x54   : > { %s1263_s14 = scalar_lea.hbm %s1837_s2, 16 }
  0x55   : > { %p1264_p7 = scmp.ne.s32.totalorder %s1837_s2, %s1263_s14  ;;  %p1270_p1 = scmp.lt.u32.totalorder %s1263_s14, %s1837_s2 }
  0x57   : > { %p1266_p9 = pnand %p1264_p7, %p1560_p8 }
  0x59   : > { %p1267_p4 = pneg %p1266_p9 }
  0x5b   : > { %p1272_p3 = pnand %p1270_p1, %p1267_p4 }
  0x5d   : > { %1275 = shalt.err (!%p1272_p3)
}
  0x5e   : > { %s1276_s13 = scalar_lea.vmem %s234_s22, 16  ;;  %s1283_s18 = scalar_lea.vmem %s234_s22, 32 }
  0x5f   : > { %p1277_p10 = scmp.ne.s32.totalorder %s234_s22, %s1276_s13  ;;  %p1284_p13 = scmp.lt.s32.totalorder %s234_s22, %s234_s22 }
  0x60   : > { %p1285_p0 = scmp.lt.s32.totalorder %s1283_s18, %s1276_s13 }
  0x61   : > { %p1279_p11 = pnand %p1277_p10, %p1560_p8 }
  0x62   : > { %p1286_p2 = por %p1285_p0, %p1284_p13 }
  0x63   : > { %p1280_p12 = pneg %p1279_p11 }
  0x65   : > { %p1287_p5 = pnand %p1286_p2, %p1280_p12 }
  0x67   : > { %1290 = shalt.err (!%p1287_p5)
}
  0x68   : > { %1100 = dma.hbm_to_vmem [thread:$0]  (!%p1546_p6), %s1837_s2, 16, %s234_s22, [#allocation7]  }
  0x69   : > { %s1291_s9 = scalar_lea.hbm %s1839_s4, 16 }
  0x6a   : > { %p1292_p7 = scmp.ne.s32.totalorder %s1839_s4, %s1291_s9  ;;  %p1298_p1 = scmp.lt.u32.totalorder %s1291_s9, %s1839_s4 }
  0x6c   : > { %p1294_p9 = pnand %p1292_p7, %p1560_p8 }
  0x6e   : > { %p1295_p4 = pneg %p1294_p9 }
  0x70   : > { %p1300_p3 = pnand %p1298_p1, %p1295_p4 }
  0x72   : > { %1303 = shalt.err (!%p1300_p3)
}
  0x73   : > { %s1304_s17 = scalar_lea.vmem %s258_s28, 16  ;;  %s1311_s22 = scalar_lea.vmem %s258_s28, 32 }
  0x74   : > { %p1305_p10 = scmp.ne.s32.totalorder %s258_s28, %s1304_s17  ;;  %p1312_p13 = scmp.lt.s32.totalorder %s258_s28, %s258_s28 }
  0x75   : > { %p1313_p0 = scmp.lt.s32.totalorder %s1311_s22, %s1304_s17 }
  0x76   : > { %p1307_p11 = pnand %p1305_p10, %p1560_p8 }
  0x77   : > { %p1314_p2 = por %p1313_p0, %p1312_p13 }
  0x78   : > { %p1308_p12 = pneg %p1307_p11 }
  0x7a   : > { %p1315_p5 = pnand %p1314_p2, %p1308_p12 }
  0x7c   : > { %1318 = shalt.err (!%p1315_p5)
}
  0x7d   : > { %1106 = dma.hbm_to_vmem [thread:$0]  (!%p1546_p6), %s1839_s4, 16, %s258_s28, [#allocation10]  }
  0x7e   : > { %s1464_s18 = smov [#allocation14]   ;;  %s1319_s23 = scalar_lea.hbm %s1841_s6, 16 }
  0x7f   : > { %s279_s29 = sshll.u32 %s1464_s18, 4  ;;  %p1320_p7 = scmp.ne.s32.totalorder %s1841_s6, %s1319_s23  ;;  %s280_s29 = int_to_ptr.vmem [resolvable:$true] %s279_s29 }
  0x80   : > { %p1326_p1 = scmp.lt.u32.totalorder %s1319_s23, %s1841_s6 }
  0x81   : > { %p1322_p9 = pnand %p1320_p7, %p1560_p8 }
  0x83   : > { %p1323_p4 = pneg %p1322_p9 }
  0x85   : > { %p1328_p3 = pnand %p1326_p1, %p1323_p4 }
  0x87   : > { %1331 = shalt.err (!%p1328_p3)
}
  0x88   : > { %s1332_s28 = scalar_lea.vmem %s280_s29, 16  ;;  %s1339_s16 = scalar_lea.vmem %s280_s29, 32 }
  0x89   : > { %p1333_p10 = scmp.ne.s32.totalorder %s280_s29, %s1332_s28  ;;  %p1340_p13 = scmp.lt.s32.totalorder %s280_s29, %s280_s29 }
  0x8a   : > { %p1341_p0 = scmp.lt.s32.totalorder %s1339_s16, %s1332_s28 }
  0x8b   : > { %p1335_p11 = pnand %p1333_p10, %p1560_p8 }
  0x8c   : > { %p1342_p2 = por %p1341_p0, %p1340_p13 }
  0x8d   : > { %p1336_p12 = pneg %p1335_p11 }
  0x8f   : > { %p1343_p5 = pnand %p1342_p2, %p1336_p12 }
  0x91   : > { %1346 = shalt.err (!%p1343_p5)
}
  0x92   : > { %1112 = dma.hbm_to_vmem [thread:$0]  (!%p1546_p6), %s1841_s6, 16, %s280_s29, [#allocation13]  }
  0x93   : > { %s997_s19 = sadd.s32 4294967294, %s1455_s27   ;;  %s1679_s11 = sadd.s32 1, %s1455_s27  }
  0x94   : > { %s30_s10 = ssub.s32 %s1455_s27, %s1679_s11  ;;  %s33_s13 = sadd.s32 1, %s1451_s26 }
  0x95   : > { %p31_p8 = scmp.eq.s32.totalorder %s30_s10, 0  ;;  %p40_p7 = scmp.ne.s32.totalorder %s1451_s26, %s1447_s25 }
  0x96   : > { %p41_p9 = scmp.eq.s32.totalorder %s1455_s27, 0  ;;  %p46_p4 = scmp.ne.s32.totalorder %s1447_s25, %s1443_s24 }
  0x97   : > { %s1690_s18 = scalar_select %p31_p8, %s1451_s26, %s33_s13  }
  0x98   : > { %p1692_p1 = por %p41_p9, %p40_p7  ;;  %p1850_p3 = scmp.eq.s32.totalorder %s1530_s30, 0 }
  0x99   : > { %p196_p10 = scmp.eq.s32.totalorder %s1530_s30, 1  ;;  %p202_p11 = scmp.eq.s32.totalorder %s997_s19, 1 }
  0x9a   : > { %p1698_p6 = por %p1850_p3, %p46_p4  ;;  %p1127_p12 = scmp.lt.s32.totalorder %s1455_s27, 2 }
  0x9b   : > { %s290_s21 = sand.u32 1, %s1451_s26   ;;  %p1705_p13 = por %p196_p10, %p40_p7 }
  0x9c   : > { %p1709_p0 = por %p202_p11, %p46_p4  ;;  %s1006_s12 = sshll.u32 %s290_s21, 2 }
  0x9d   : > { %s1852_s23 = scalar_select %p1705_p13, 1, 0 }
  0x9e   : > { %s1853_s9 = scalar_select %p1709_p0, 1, 0 }
  0x9f   : > { %s1007_s14 = sshll.u32 %s1455_s27, 6  ;;  %s294_s17 = scalar_lea.vmem [#allocation3], %s1006_s12 }
  0xa0   : > { %s1717_s16 = scalar_lea.hbm %s1835_s0, %s1007_s14  ;;  %s301_s22 = sshll.u32 %s294_s17, 4  ;;  %s1719_s22 = int_to_ptr.vmem [resolvable:$true] %s301_s22 }
  0xa1   : > { %p1723_p2 = pnand %p1127_p12, %p1692_p1  ;;  %s291_s10 = scalar_lea.sflag [#allocation4], %s290_s21 }
  0xa2   : > { %s1347_s13 = scalar_lea.hbm %s1717_s16, 64  ;;  %s1352_s15 = scalar_lea.hbm %s1835_s0, 128 }
  0xa3   : > { %p1348_p5 = scmp.ne.s32.totalorder %s1717_s16, %s1347_s13  ;;  %p1349_p8 = pneg %p1723_p2 }
  0xa4   : > { %p1353_p4 = scmp.lt.u32.totalorder %s1717_s16, %s1835_s0  ;;  %p1354_p1 = scmp.lt.u32.totalorder %s1352_s15, %s1347_s13 }
  0xa5   : > { %p1350_p7 = pnand %p1349_p8, %p1348_p5  ;;  %p1356_p10 = scmp.lt.u32.totalorder %s1347_s13, %s1717_s16 }
  0xa6   : > { %p1355_p3 = por %p1354_p1, %p1353_p4 }
  0xa7   : > { %p1351_p9 = pneg %p1350_p7 }
  0xa8   : > { %p1357_p11 = por %p1356_p10, %p1355_p3 }
  0xaa   : > { %p1358_p12 = pnand %p1357_p11, %p1351_p9 }
  0xac   : > { %1361 = shalt.err (!%p1358_p12)
}
  0xad   : > { %s1362_s21 = scalar_lea.vmem %s1719_s22, 64  ;;  %s1465_s17 = smov [#allocation3]  }
  0xae   : > { %p1363_p5 = scmp.ne.s32.totalorder %s1719_s22, %s1362_s21  ;;  %s1367_s12 = sshll.u32 %s1465_s17, 4  ;;  %s1368_s12 = int_to_ptr.vmem [resolvable:$false] %s1367_s12 }
  0xaf   : > { %s1369_s14 = scalar_lea.vmem %s1368_s12, 128  ;;  %p1370_p13 = scmp.lt.s32.totalorder %s1719_s22, %s1368_s12 }
  0xb0   : > { %p1365_p7 = pnand %p1363_p5, %p1349_p8  ;;  %p1371_p4 = scmp.lt.s32.totalorder %s1369_s14, %s1362_s21 }
  0xb2   : > { %p1366_p0 = pneg %p1365_p7  ;;  %p1372_p1 = por %p1371_p4, %p1370_p13 }
  0xb4   : > { %p1373_p3 = pnand %p1372_p1, %p1366_p0 }
  0xb6   : > { %1376 = shalt.err (!%p1373_p3)
}
  0xb7   : > { %1116 = dma.hbm_to_vmem [thread:$0]  (!%p1723_p2), %s1717_s16, 64, %s1719_s22, %s291_s10  }
  0xb8   : > { %p1855_p9 = scmp.ne.s32.totalorder %s1846_s8, 0 }
  0xb9   : > { %s1755_s13 = sand.u32 (!%p1855_p9), 1, %s1447_s25  }
  0xba   : > { %310 = sbr.rel (%p1855_p9) target bundleno = 1120 (0x460), region = 48  ;;  %s1009_s15 = sshll.u32 (!%p1855_p9), %s1755_s13, 2 }
  0xbb   : > { %s313_s20 = scalar_lea.sflag (!%p1855_p9), [#allocation4], %s1755_s13  ;;  %s316_s28 = scalar_lea.vmem (!%p1855_p9), [#allocation3], %s1009_s15 }
  0xc1   : > { %1422 = dma.done.wait (%p1698_p6), %s313_s20, 64  }
  0xc2   : > { %1424 = vsyncadd (%p1698_p6), %s313_s20, 4294967232  ;;  %p1856_p13 = scmp.eq.s32.totalorder %s1530_s30, 0 }
  0xc4   : > { %1426 = dma.done.wait (%p1856_p13), [#allocation7], 144   ;;  %p1857_p0 = pmov %p1856_p13 }
  0xc6   : > { %1428 = vsyncadd (%p1857_p0), [#allocation7], 4294967152  ;;  %p1858_p2 = pmov %p1857_p0 }
  0xc7   : > { %p1859_p8 = pmov %p1857_p0 }
  0xc8   : > { %1430 = dma.done.wait (%p1858_p2), [#allocation10], 528  }
  0xc9   : > { %1432 = vsyncadd (%p1859_p8), [#allocation10], 4294966768  ;;  %p1860_p10 = pmov %p1857_p0 }
  0xca   : > { %p1861_p11 = pmov %p1857_p0 }
  0xcb   : > { %1434 = dma.done.wait (%p1860_p10), [#allocation13], 32  }
  0xcc   : > { %1436 = vsyncadd (%p1861_p11), [#allocation13], 4294967264  ;;  %v1466_v0 = vmov 0.0   ;;  %vm1467_vm0 = vmmov 0   ;;  %vm380_vm1 = vcmask 1043456   ;;  %vm376_vm2 = vcmask 31744  }
  0xcd   : > { %1041 = vmatprep.subr.mxu0 %v1466_v0  ;;  %1043 = vmatprep.mubr.msk.f32.mxu0 %vm1467_vm0, %v1466_v0  ;;  %v375_v1 = vld [vmem:[%s316_s28] sm:$0xf]  ;;  %v374_v2 = vld [vmem:[#allocation6] sm:$0xff]  ;;  %v507_v6 = vld [vmem:[#allocation9] sm:$0xff]  ;;  %vm503_vm4 = vcmask 64512   ;;  %v371_v29 = vlaneseq  ;;  %vm824_vm8 = vcmask 1045504  }
  0xce   : > { %1046 = vmatprep.subr.mxu1 %v1466_v0  ;;  %1048 = vmatprep.mubr.msk.f32.mxu1 %vm1467_vm0, %v1466_v0  ;;  %v510_v5 = vld [vmem:[#allocation9 + $0x8] sm:$0xff]  ;;  %v1019_v7 = vld [vmem:[#allocation8] ss:$0 sm:$0xff]  ;;  %v659_v18 = vld [vmem:[#allocation9 + $0x10] sm:$0xff]  ;;  %s1016_s8 = sshll.u32 %s1755_s13, 3  ;;  %s1028_s29 = sshll.u32 %s1530_s30, 7 }
  0xcf   : > { %1042 = vmatpush3.msk.msra.mxu0 %vm380_vm1, %v375_v1  ;;  %1047 = vmatpush3.msra.mxu1 %v510_v5  ;;  %v736_v19 = vld [vmem:[#allocation9 + $0x18] sm:$0xff]  ;;  %v1024_v35 = vld [vmem:[#allocation11] ss:$0 sm:$0xff]  ;;  %v372_v37 = vand.u32 127, %v371_v29  ;;  %v1025_v54 = vld [vmem:[#allocation12] ss:$0 sm:$0xff]  ;;  %s1791_s21 = scalar_lea.hbm %s1842_s7, %s1028_s29 }
  0xd0   : > { %1044 = vmatmul.mubr.msk.f32.vlgmr.msra.gmra.mrb[0].mxu0 %vm376_vm2, %v374_v2  ;;  %1051 = vmatprep.subr.mxu0 %v1466_v0  ;;  %v1026_v56 = vld [vmem:[#allocation14] ss:$0 sm:$0xff]  ;;  %s370_s16 = scalar_lea.vmem [#allocation15], %s1016_s8  ;;  %s857_s17 = scalar_lea.sflag [#allocation5], %s1755_s13 }
  0xd1   : > { %1053 = vmatprep.mubr.msk.f32.mxu0 %vm1467_vm0, %v1466_v0  ;;  %1052 = vmatpush3.msra.mxu0 %v507_v6  ;;  %vm373_vm6 = vcmp.lt.s32.totalorder %v372_v37, 16  ;;  %s870_s22 = sshll.u32 %s370_s16, 4  ;;  %p1862_p12 = scmp.ne.s32.totalorder %s1852_s23, 0  ;;  %s1793_s22 = int_to_ptr.vmem [resolvable:$true] %s870_s22 }
  0xd2   : > { %1056 = vmatprep.subr.mxu1 %v1466_v0  ;;  %1061 = vmatprep.subr.mxu0 %v1466_v0  ;;  %s1377_s12 = scalar_lea.vmem %s1793_s22, 128  ;;  %s1468_s30 = smov [#allocation15]  }
  0xd3   : > { %p1378_p6 = scmp.ne.s32.totalorder %s1793_s22, %s1377_s12  ;;  %s1381_s14 = sshll.u32 %s1468_s30, 4  ;;  %s1382_s14 = int_to_ptr.vmem [resolvable:$false] %s1381_s14 }
  0xd4   : > { %s1383_s15 = scalar_lea.vmem %s1382_s14, 256  ;;  %p1384_p4 = scmp.lt.s32.totalorder %s1793_s22, %s1382_s14 }
  0xd5   : > { %p1379_p5 = pnand %p1378_p6, %p1862_p12  ;;  %p1385_p1 = scmp.lt.s32.totalorder %s1383_s15, %s1377_s12 }
  0xd7   : > { %p1380_p7 = pneg %p1379_p5  ;;  %p1386_p3 = por %p1385_p1, %p1384_p4 }
  0xd9   : > { %p1387_p9 = pnand %p1386_p3, %p1380_p7 }
 0x1a3   : > { %v450_v3 = vpop.f32.mrb[0].mxu0 }
 0x1a4   : > { %454 = vxpose.xlu0.b32.start.end [1/1] (short) (narrow) %v450_v3, 16  ;;  %v1045_v4 = vpop.f32.mrb[1].mxu0 }
 0x224   : > { %v470_v8 = vpop.trf.xlu0 }
 0x225   : > { %v493_v9 = vadd.f32 %v1019_v7, %v470_v8 }
 0x227   : > { %vm495_vm3 = vcmp.lt.f32.partialorder %v493_v9, 0.0  ;;  %v497_v10 = vceil.f32 %v493_v9  ;;  %v499_v11 = vfloor.f32 %v493_v9 }
 0x228   : > { %v471_v12 = vpop.trf.xlu0 }
 0x229   : > { %v501_v13 = vsel %vm495_vm3, %v497_v10, %v499_v11  ;;  %v494_v14 = vadd.f32 %v1019_v7, %v471_v12 }
 0x22a   : > { %504 = vst.msk [vmem:[#allocation2] sm:$0xff] %vm503_vm4, %v501_v13 }
 0x22b   : > { %vm496_vm5 = vcmp.lt.f32.partialorder %v494_v14, 0.0  ;;  %v498_v15 = vceil.f32 %v494_v14  ;;  %v500_v16 = vfloor.f32 %v494_v14 }
 0x22d   : > { %v502_v17 = vsel %vm496_vm5, %v498_v15, %v500_v16 }
 0x22e   : > { %505 = vst.msk [vmem:[#allocation2 + $0x8] sm:$0xff] %vm503_vm4, %v502_v17 }
 0x235   : > { %v509_v20 = vld [vmem:[#allocation2 + $0x1] ss:$2 sm:$0x3f]  ;;  %v506_v21 = vld [vmem:[#allocation2] ss:$2 sm:$0x3f] }
 0x236   : > { %1049 = vmatmul.mubr.msk.f32.vlgmr.msra.gmra.mrb[0].mxu1 %vm503_vm4, %v509_v20  ;;  %1054 = vmatmul.mubr.msk.f32.vlgmr.msra.gmra.mrb[2].mxu0 %vm503_vm4, %v506_v21  ;;  %v658_v22 = vld [vmem:[#allocation2 + $0x2] ss:$2 sm:$0x3f]  ;;  %v735_v23 = vld [vmem:[#allocation2 + $0x3] ss:$2 sm:$0x3f] }
 0x237   : > { %1057 = vmatpush3.msra.mxu1 %v659_v18  ;;  %1062 = vmatpush3.msra.mxu0 %v736_v19 }
 0x238   : > { %1058 = vmatprep.mubr.msk.f32.mxu1 %vm1467_vm0, %v1466_v0  ;;  %1063 = vmatprep.mubr.msk.f32.mxu0 %vm1467_vm0, %v1466_v0 }
 0x23a   : > { %1059 = vmatmul.mubr.msk.f32.vlgmr.msra.gmra.mrb[2].mxu1 %vm503_vm4, %v658_v22  ;;  %1064 = vmatmul.mubr.msk.f32.vlgmr.msra.gmra.mrb[4].mxu0 %vm503_vm4, %v735_v23 }
 0x309   : > { %v580_v24 = vpop.f32.mrb[0].mxu1  ;;  %v653_v25 = vpop.f32.mrb[2].mxu0 }
 0x30a   : > { %v654_v26 = vadd.f32 %v653_v25, %v580_v24  ;;  %v1050_v27 = vpop.f32.mrb[1].mxu1  ;;  %v1055_v28 = vpop.f32.mrb[3].mxu0 }
 0x30d   : > { %v729_v30 = vpop.f32.mrb[2].mxu1  ;;  %v806_v31 = vpop.f32.mrb[4].mxu0 }
 0x30e   : > { %v733_v32 = vadd.f32 %v729_v30, %v654_v26  ;;  %v1060_v33 = vpop.f32.mrb[3].mxu1  ;;  %v1065_v34 = vpop.f32.mrb[5].mxu0 }
 0x310   : > { %v810_v36 = vadd.f32 %v806_v31, %v733_v32 }
 0x312   : > { %v818_v38 = vadd.f32 %v1024_v35, %v810_v36 }
 0x314   : > { %vm819_vm7 = vcmp.lt.f32.partialorder %v818_v38, 0.0  ;;  %v820_v39 = vceil.f32 %v818_v38  ;;  %v821_v40 = vfloor.f32 %v818_v38 }
 0x316   : > { %v822_v41 = vsel %vm819_vm7, %v820_v39, %v821_v40 }
 0x317   : > { %v823_v42 = vsel %vm373_vm6, %v822_v41, 0.0 }
 0x318   : > { %v825_v43 = vsel %vm824_vm8, %v823_v42, 0.0 }
 0x319   : > { %826 = vadd.xlane.f32.xlu0 %v825_v43 }
 0x3a6   : > { %v827_v44 = vpop.xlane.xlu0 %826 }
 0x3a7   : > { %v828_v45 = vmul.f32 0.0625, %v827_v44 }
 0x3a9   : > { %v829_v46 = vsub.f32 %v823_v42, %v828_v45 }
 0x3ab   : > { %v830_v47 = vsel %vm373_vm6, %v829_v46, 0.0 }
 0x3ac   : > { %v831_v48 = vmul.f32 %v830_v47, %v830_v47 }
 0x3ae   : > { %v832_v49 = vsel %vm824_vm8, %v831_v48, 0.0 }
 0x3af   : > { %833 = vadd.xlane.f32.xlu1 %v832_v49 }
 0x43c   : > { %v834_v50 = vpop.xlane.xlu1 %833 }
 0x43d   : > { %v835_v51 = vmul.f32 0.0625, %v834_v50 }
 0x43f   : > { %v836_v52 = vadd.f32 1e-05, %v835_v51 }
 0x441   : > { %1177 = vrsqrt.f32 %v836_v52 }
 0x44b   : > { %v1178_v53 = vpop.eup %1177 }
 0x44c   : > { %v838_v55 = vmul.f32 %v1178_v53, %v829_v46 }
 0x44e   : > { %v846_v57 = vmul.f32 %v1025_v54, %v838_v55 }
 0x450   : > { %v854_v58 = vadd.f32 %v1026_v56, %v846_v57 }
 0x452   : > { %855 = vst [vmem:[%s370_s16] sm:$0x3f] %v854_v58 }
 0x453   : > { %1390 = shalt.err (!%p1387_p9)
}
 0x454   : > { %s1391_s13 = scalar_lea.hbm %s1791_s21, 128  ;;  %s1395_s8 = scalar_lea.hbm %s1842_s7, 256 }
 0x455   : > { %p1392_p13 = scmp.ne.s32.totalorder %s1791_s21, %s1391_s13  ;;  %p1396_p8 = scmp.lt.u32.totalorder %s1791_s21, %s1842_s7 }
 0x456   : > { %p1397_p10 = scmp.lt.u32.totalorder %s1395_s8, %s1391_s13  ;;  %p1399_p6 = scmp.lt.u32.totalorder %s1391_s13, %s1791_s21 }
 0x457   : > { %p1393_p0 = pnand %p1392_p13, %p1862_p12 }
 0x458   : > { %p1398_p11 = por %p1397_p10, %p1396_p8 }
 0x459   : > { %p1394_p2 = pneg %p1393_p0 }
 0x45a   : > { %p1400_p5 = por %p1399_p6, %p1398_p11 }
 0x45c   : > { %p1401_p7 = pnand %p1400_p5, %p1394_p2 }
 0x45e   : > { %1404 = shalt.err (!%p1401_p7)
}
 0x45f   : > { %1092 = dma.vmem_to_hbm [thread:$0]  (%p1862_p12), %s1793_s22, 128, %s1791_s21, %s857_s17  }
 0x460 PF: > { %s882_s19 = sand.u32 1, %s1443_s24   ;;  %p1863_p4 = scmp.ne.s32.totalorder %s1853_s9, 0 }
 0x461   : > { %p1864_p1 = scmp.ge.s32.totalorder %s1455_s27, 2  ;;  %s883_s10 = scalar_lea.sflag [#allocation5], %s882_s19 }
 0x463   : > { %p1118_p3 = pnand %p1864_p1, %p1863_p4 }
 0x465   : > { %1438 = dma.done.wait (!%p1118_p3), %s883_s10, 128  }
 0x466   : > { %1440 = vsyncadd (!%p1118_p3), %s883_s10, 4294967168  ;;  %p23_p9 = scmp.ge.s32.totalorder %s1679_s11, 4   ;;  %s1865_s24 = smov %s1447_s25 }
 0x467   : > { %s1866_s25 = smov %s1451_s26  ;;  %s1867_s26 = smov %s1690_s18 }
 0x468   : > { %s1868_s27 = smov %s1679_s11  ;;  %25 = sbr.rel (!%p23_p9) target bundleno = 8 (0x8), region = 120 }
 0x46f   :  { %888 = vsyncpa [#allocation4], 1 }
 0x470   :  { %890 = vsyncpa [#allocation4 + $0x1], 1 }
 0x471   :  { %891 = vsyncpa [#allocation7], 1 }
 0x472   :  { %892 = vsyncpa [#allocation10], 1 }
 0x473   :  { %893 = vsyncpa [#allocation13], 1 }
 0x474   :  { %894 = vsyncpa [#allocation5], 1 }
 0x475   :  { %896 = vsyncpa [#allocation5 + $0x1], 1 }

</bundles_post_ra>
